<compile_context>
chip_gen: v7x
topology: tpu7x:2x2x1
jax: 0.10.0
libtpu: 0.0.40
codegen_flags: <defaults>
</compile_context>

<pallas_src>
import functools

import jax
import jax.numpy as jnp
from jax.experimental import pallas as pl
from jax.experimental.pallas import tpu as pltpu

SMOOTHING = 0.1


def _round_up(x, m):
    return (x + m - 1) // m * m


def _label_smoothing_ce_kernel(logits_ref, targets_ref, loss_ref, *,
                               smoothing, n_rows):
    x = logits_ref[...].astype(jnp.float32)                # (TILE_N, C)
    tn, c = x.shape

    # Numerically stable log-softmax pieces, per row.
    m = jnp.max(x, axis=-1, keepdims=True)                  # (TILE_N, 1)
    shifted = x - m                                          # (TILE_N, C)
    lse = jnp.log(jnp.sum(jnp.exp(shifted), axis=-1, keepdims=True))

    # Smoothed-target weights: 1-eps at the target column, eps/(C-1) elsewhere.
    # sum_c w_c == 1 exactly, so
    #   loss_i = -sum_c w_c * log_probs_ic = lse_i - sum_c w_c * shifted_ic.
    off = jnp.float32(smoothing / (c - 1))                   # hoisted scalars
    on = jnp.float32(1.0 - smoothing)
    col_ids = jax.lax.broadcasted_iota(jnp.int32, (tn, c), 1)
    tgt = targets_ref[...]                                   # (TILE_N, 1) int32
    # NOTE: out-of-range targets (<0 or >=C) never match the iota and silently
    # behave as all-off-target weight; the torch reference would error instead.
    w_shifted = jnp.where(col_ids == tgt, on, off) * shifted
    loss = lse - jnp.sum(w_shifted, axis=-1, keepdims=True)  # (TILE_N, 1)

    # Mask rows past the true batch size: the ragged last block reads
    # unspecified data, and its losses must not leak NaN/Inf into the output.
    row_ids = (pl.program_id(0) * tn
               + jax.lax.broadcasted_iota(jnp.int32, (tn, 1), 0))
    loss_ref[...] = jnp.where(row_ids < n_rows, loss, 0.0)


def _choose_tile_n(n, c, itemsize):
    # VMEM bytes per tile row: double-buffered HBM logits tile plus ~3 f32
    # temporaries (upcast copy / shifted / exp-or-weighted-product) used by the
    # in-kernel log-softmax math.
    per_row = 2 * c * itemsize + 3 * c * 4
    budget = 16 * 1024 * 1024            # headroom inside the 32 MiB scoped VMEM
    t = max(8, budget // per_row)
    # Keep >=4 balanced tiles when the batch allows it so the "parallel" grid
    # axis can be sharded across v7x's two TensorCores.
    quarter = _round_up(max(pl.cdiv(n, 4), 8), 8)
    t = min(t, quarter)
    t = max(8, (t // 8) * 8)
    return min(t, _round_up(n, 8))


def label_smoothing_cross_entropy(logits, targets, smoothing=SMOOTHING,
                                  tile_n=None):
    """logits: (N, C) float (f32 or bf16 from the producer); targets: (N,) int.

    Returns the scalar mean label-smoothed cross-entropy (f32).
    """
    n, c = logits.shape
    itemsize = jnp.dtype(logits.dtype).itemsize
    if tile_n is None:
        tile_n = _choose_tile_n(n, c, itemsize)
    tile_n = max(8, (tile_n // 8) * 8)

    targets2d = targets.astype(jnp.int32).reshape(n, 1)
    num_tiles = pl.cdiv(n, tile_n)

    losses = pl.pallas_call(
        functools.partial(_label_smoothing_ce_kernel,
                          smoothing=smoothing, n_rows=n),
        out_shape=jax.ShapeDtypeStruct((n, 1), jnp.float32),
        grid=(num_tiles,),
        in_specs=[
            pl.BlockSpec((tile_n, c), lambda i: (i, 0)),
            pl.BlockSpec((tile_n, 1), lambda i: (i, 0)),
        ],
        out_specs=pl.BlockSpec((tile_n, 1), lambda i: (i, 0)),
        compiler_params=pltpu.CompilerParams(
            dimension_semantics=("parallel",),
            vmem_limit_bytes=32 * 1024 * 1024),
        cost_estimate=pl.CostEstimate(
            flops=5 * n * c,
            transcendentals=n * c,
            bytes_accessed=n * c * itemsize + n * 4 + n * 4),
    )(logits, targets2d)

    # TODO(synk): for vocab-scale C where a full row tile (bf16 tile + f32
    # temps) no longer fits VMEM (binding first on v7x's 64 MiB), add a second
    # "arbitrary" grid axis over C with an online running-max / running-sum-exp
    # log-softmax so logits are still read from HBM only once.
    return jnp.sum(losses) / jnp.float32(n)


def _reference(logits, targets, smoothing=SMOOTHING):
    logits = logits.astype(jnp.float32)
    log_probs = jax.nn.log_softmax(logits, axis=-1)
    n, c = logits.shape
    smooth = jnp.full((n, c), smoothing / (c - 1), dtype=jnp.float32)
    smooth = smooth.at[jnp.arange(n), targets].set(1.0 - smoothing)
    return jnp.mean(-jnp.sum(smooth * log_probs, axis=-1))


if __name__ == "__main__":
    key = jax.random.PRNGKey(0)
    k1, k2, k3, k4 = jax.random.split(key, 4)

    # Case 1: small single-tile config (matches the module's toy usage).
    logits = jax.random.normal(k1, (8, 16), dtype=jnp.float32)
    targets = jax.random.randint(k2, (8,), 0, 16, dtype=jnp.int32)
    loss = label_smoothing_cross_entropy(logits, targets)
    jax.block_until_ready(loss)
    ref = _reference(logits, targets)
    assert jnp.allclose(loss, ref, atol=1e-5, rtol=1e-5), (loss, ref)

    # Case 2: multiple grid tiles + ragged last block (N % TILE_N != 0),
    # exercising the no-pad partial-block path and in-kernel row masking.
    logits2 = jax.random.normal(k3, (37, 128), dtype=jnp.float32)
    targets2 = jax.random.randint(k4, (37,), 0, 128, dtype=jnp.int32)
    loss2 = label_smoothing_cross_entropy(logits2, targets2, tile_n=16)
    jax.block_until_ready(loss2)
    ref2 = _reference(logits2, targets2)
    assert jnp.allclose(loss2, ref2, atol=1e-5, rtol=1e-5), (loss2, ref2)

    print("KERNEL_OK")
</pallas_src>

<mosaic_0001>
module attributes {stable_mosaic.version = 11 : i64} {
  func.func @_label_smoothing_ce_kernel(%arg0: i32, %arg1: memref<8x16xf32, #tpu.memory_space<vmem>>, %arg2: memref<8x1xi32, #tpu.memory_space<vmem>>, %arg3: memref<8x1xf32, #tpu.memory_space<vmem>>) attributes {dimension_semantics = [#tpu.dimension_semantics<parallel>], iteration_bounds = array<i64: 1>, scalar_prefetch = 0 : i64, scratch_operands = 0 : i64, tpu.core_type = #tpu.core_type<tc>, window_params = [{transform_indices = @transform_0, window_bounds = array<i64: 8, 16>}, {transform_indices = @transform_1, window_bounds = array<i64: 8, 1>}, {transform_indices = @transform_2, window_bounds = array<i64: 8, 1>}]} {
    %c0 = arith.constant 0 : index
    %c0_0 = arith.constant 0 : index
    %0 = vector.load %arg1[%c0, %c0_0] : memref<8x16xf32, #tpu.memory_space<vmem>>, vector<8x16xf32>
    %cst = arith.constant dense<0xFF800000> : vector<8xf32>
    %1 = vector.multi_reduction <maximumf>, %0, %cst [1] : vector<8x16xf32> to vector<8xf32>
    %2 = vector.shape_cast %1 : vector<8xf32> to vector<8x1xf32>
    %3 = vector.broadcast %2 : vector<8x1xf32> to vector<8x16xf32>
    %4 = arith.subf %0, %3 : vector<8x16xf32>
    %5 = math.exp %4 : vector<8x16xf32>
    %cst_1 = arith.constant dense<0.000000e+00> : vector<8xf32>
    %6 = vector.multi_reduction <add>, %5, %cst_1 [1] : vector<8x16xf32> to vector<8xf32>
    %7 = vector.shape_cast %6 : vector<8xf32> to vector<8x1xf32>
    %8 = math.log %7 : vector<8x1xf32>
    %9 = tpu.iota {dimensions = array<i32: 1>} : vector<8x16xi32>
    %c0_2 = arith.constant 0 : index
    %c0_3 = arith.constant 0 : index
    %10 = vector.load %arg2[%c0_2, %c0_3] : memref<8x1xi32, #tpu.memory_space<vmem>>, vector<8x1xi32>
    %11 = vector.broadcast %10 : vector<8x1xi32> to vector<8x16xi32>
    %12 = arith.cmpi eq, %9, %11 : vector<8x16xi32>
    %cst_4 = arith.constant 0.899999976 : f32
    %cst_5 = arith.constant 0.00666666683 : f32
    %13 = vector.broadcast %cst_4 : f32 to vector<8x16xf32>
    %14 = vector.broadcast %cst_5 : f32 to vector<8x16xf32>
    %15 = arith.select %12, %13, %14 : vector<8x16xi1>, vector<8x16xf32>
    %16 = arith.mulf %15, %4 : vector<8x16xf32>
    %cst_6 = arith.constant dense<0.000000e+00> : vector<8xf32>
    %17 = vector.multi_reduction <add>, %16, %cst_6 [1] : vector<8x16xf32> to vector<8xf32>
    %18 = vector.shape_cast %17 : vector<8xf32> to vector<8x1xf32>
    %19 = arith.subf %8, %18 : vector<8x1xf32>
    %c8_i32 = arith.constant 8 : i32
    %20 = arith.muli %arg0, %c8_i32 : i32
    %21 = tpu.iota {dimensions = array<i32: 0>} : vector<8x1xi32>
    %22 = vector.broadcast %20 : i32 to vector<8x1xi32>
    %23 = arith.addi %22, %21 : vector<8x1xi32>
    %c8_i32_7 = arith.constant 8 : i32
    %24 = vector.broadcast %c8_i32_7 : i32 to vector<8x1xi32>
    %25 = arith.cmpi slt, %23, %24 : vector<8x1xi32>
    %cst_8 = arith.constant 0.000000e+00 : f32
    %26 = vector.broadcast %cst_8 : f32 to vector<8x1xf32>
    %27 = arith.select %25, %19, %26 : vector<8x1xi1>, vector<8x1xf32>
    %c0_9 = arith.constant 0 : index
    %c0_10 = arith.constant 0 : index
    %28 = vector.load %arg3[%c0_9, %c0_10] : memref<8x1xf32, #tpu.memory_space<vmem>>, vector<8x1xf32>
    tpu.vector_store %arg3[%c0_9, %c0_10], %27 {strides = array<i32>} : memref<8x1xf32, #tpu.memory_space<vmem>>, vector<8x1xf32>,
    return
  }
  func.func @transform_0(%arg0: i32) -> (i32, i32) {
    %c0_i32 = arith.constant 0 : i32
    %c0_i32_0 = arith.constant 0 : i32
    return %arg0, %c0_i32 : i32, i32
  }
  func.func @transform_1(%arg0: i32) -> (i32, i32) {
    %c0_i32 = arith.constant 0 : i32
    %c0_i32_0 = arith.constant 0 : i32
    return %arg0, %c0_i32 : i32, i32
  }
  func.func @transform_2(%arg0: i32) -> (i32, i32) {
    %c0_i32 = arith.constant 0 : i32
    %c0_i32_0 = arith.constant 0 : i32
    return %arg0, %c0_i32 : i32, i32
  }
}

</mosaic_0001>

<bundles_post_ra>
// kernel: tpu_custom_call.1
= control target key start
LH: loop header
LB: loop body
LE: loop exit
PB: predicated region body
PF: predicated region fallthrough
CT: control target
= control target key end

     0   :  { %vm12_vm0 = vcmask 130048   ;;  %v57_v1 = vmov 0   ;;  %v24_v6 = vlaneseq  ;;  %v58_v10 = vmov 0.006666667   ;;  %s86_s0 = inlined_call_operand.vmem [shape: f32[8,16], index: 0, kind: input, shape index: {}]   ;;  %s87_s1 = inlined_call_operand.vmem [shape: s32[8,1], index: 1, kind: input, shape index: {}]   ;;  %s88_s2 = inlined_call_operand.vmem [shape: f32[8,1], index: 2, kind: output, shape index: {}]  }
   0x1   :  { %v11_v0 = vld [vmem:[%s86_s0] sm:$0xff]  ;;  %52 = vset.pattern.permute.xlu0 %v57_v1  ;;  %vm44_vm2 = vcmask 7168  }
   0x2   :  { %v13_v2 = vsel %vm12_vm0, %v11_v0, -inf  ;;  %v26_v3 = vld [vmem:[%s87_s1] sm:$0xff]  ;;  %v25_v8 = vand.u32 127, %v24_v6 }
   0x3   :  { %14 = vmax.xlane.f32.xlu0 %v13_v2 }
  0x19   :  { %28 = vperm.xlu0 %52, %v26_v3  }
  0x90   :  { %v15_v4 = vpop.xlane.xlu0 %14 }
  0x91   :  { %v16_v5 = vsub.f32 %v11_v0, %v15_v4 }
  0x93   :  { %v17_v7 = vmul.f32 1.442695, %v16_v5 }
  0x95   :  { %53 = vpow2.f32 %v17_v7 }
  0x98   :  { %v29_v9 = vpop.permute.xlu0 %28 }
  0x99   :  { %vm30_vm1 = vcmp.eq.s32.totalorder %v25_v8, %v29_v9 }
  0x9a   :  { %v31_v11 = vsel %vm30_vm1, 0.9, %v58_v10 }
  0x9b   :  { %v32_v14 = vmul.f32 %v31_v11, %v16_v5 }
  0x9d   :  { %v33_v15 = vsel %vm12_vm0, %v32_v14, 0.0 }
  0x9f   :  { %v54_v12 = vpop.eup %53 }
  0xa0   :  { %v19_v13 = vsel %vm12_vm0, %v54_v12, 0.0 }
  0xa1   :  { %20 = vadd.xlane.f32.xlu1 %v19_v13 }
  0xa5   :  { %34 = vadd.xlane.f32.xlu1 %v33_v15 }
 0x12e   :  { %v21_v16 = vpop.xlane.xlu1 %20 }
 0x12f   :  { %55 = vlog2.f32 %v21_v16 }
 0x132   :  { %v35_v19 = vpop.xlane.xlu1 %34 }
 0x139   :  { %v56_v17 = vpop.eup %55 }
 0x13a   :  { %v23_v18 = vmul.f32 0.6931472, %v56_v17 }
 0x13c   :  { %v36_v20 = vsub.f32 %v23_v18, %v35_v19 }
 0x13e   :  { %45 = vst.msk [vmem:[%s88_s2] sm:$0xff] %vm44_vm2, %v36_v20 }

</bundles_post_ra>
